<compile_context>
chip_gen: v6e
topology: v6e:2x2x1
jax: 0.10.0
libtpu: 0.0.40
codegen_flags: <defaults>
</compile_context>

<pallas_src>
import math

import jax
import jax.numpy as jnp
from jax.experimental import pallas as pl
from jax.experimental.pallas import tpu as pltpu

# ----------------------------- configuration -------------------------------
B = 2          # batch
S = 8          # sequence length
D = 32         # d_model
H = 4          # number of heads
DH = D // H    # head dim
F = 64         # feed-forward hidden dim
N = B * S      # folded row count
LN_EPS = 1e-5  # nn.LayerNorm default


# ------------------------------- kernel ------------------------------------
def encoder_block_kernel(x_ref,
                         wqkv_ref, bqkv_ref,
                         wo_ref, bo_ref,
                         w1_ref, b1_ref, w2_ref, b2_ref,
                         gamma_ref, beta_ref,
                         o_ref):
    x = x_ref[...]                                  # (N, D) f32, N = B*S
    gamma = gamma_ref[...]                          # (1, D)
    beta = beta_ref[...]                            # (1, D)
    wo = wo_ref[...]                                # (D, D)

    def layer_norm(v):                              # f32 elementwise (v5e-safe)
        mu = jnp.mean(v, axis=-1, keepdims=True)
        var = jnp.mean((v - mu) ** 2, axis=-1, keepdims=True)
        return (v - mu) * jax.lax.rsqrt(var + LN_EPS) * gamma + beta

    # ---- fused QKV projection: one (N, D) @ (D, 3D) MXU pass, f32 ----------
    qkv = jnp.dot(x, wqkv_ref[...], preferred_element_type=jnp.float32) + bqkv_ref[...]
    scale = 1.0 / math.sqrt(DH)
    q = qkv[:, :D] * scale                          # scale folded into q once
    k = qkv[:, D:2 * D]
    v = qkv[:, 2 * D:]

    # ---- multi-head self-attention (mask=None in the reference forward) ----
    # Scores: lax.dot_general contracting the head dim of q against the head
    # dim of k (no explicit kh.T materialization).
    dn = (((1,), (1,)), ((), ()))                   # q·kᵀ without a transpose
    score_tiles = []
    for b in range(B):                              # static tiny loops (B=2, H=4)
        r = slice(b * S, (b + 1) * S)
        for h in range(H):
            c = slice(h * DH, (h + 1) * DH)
            score_tiles.append(
                jax.lax.dot_general(q[r, c], k[r, c], dn,
                                    preferred_element_type=jnp.float32))  # (S, S)

    # Batched softmax: one sublane-stacked (B*H*S, S) tile, a single
    # max/exp/sum/normalize pass instead of 8 tiny ones.
    s_all = jnp.concatenate(score_tiles, axis=0)                  # (B*H*S, S)
    s_all = s_all - jnp.max(s_all, axis=-1, keepdims=True)
    p_all = jnp.exp(s_all)
    p_all = p_all / jnp.sum(p_all, axis=-1, keepdims=True)        # exact divide

    # Heads accumulate directly through the matching rows of Wo (no lane-axis
    # concatenate of head outputs).
    batch_out = []
    idx = 0
    for b in range(B):
        r = slice(b * S, (b + 1) * S)
        acc = jnp.zeros((S, D), jnp.float32)
        for h in range(H):
            c = slice(h * DH, (h + 1) * DH)
            p_bh = p_all[idx * S:(idx + 1) * S, :]                # (S, S)
            idx += 1
            hv = jnp.dot(p_bh, v[r, c], preferred_element_type=jnp.float32)   # (S, DH)
            acc = acc + jnp.dot(hv, wo[c, :], preferred_element_type=jnp.float32)
        batch_out.append(acc)
    attn = jnp.concatenate(batch_out, axis=0) + bo_ref[...]       # (N, D)

    # ---- add & norm 1 ----
    y = layer_norm(x + attn)

    # ---- feed-forward (f32 matmuls, f32 elementwise) ----
    h1 = jnp.dot(y, w1_ref[...], preferred_element_type=jnp.float32) + b1_ref[...]
    h1 = jnp.maximum(h1, 0.0)
    ffn = jnp.dot(h1, w2_ref[...], preferred_element_type=jnp.float32) + b2_ref[...]

    # ---- add & norm 2 (shared gamma/beta) ----
    o_ref[...] = layer_norm(y + ffn)


# --------------------------- parameter packing -------------------------------
def pack_params(params):
    """One-time fusion of the Q/K/V projection weights (done OUTSIDE the per-call
    jit path so no concat / extra HBM traffic is paid per invocation)."""
    (wq, wk, wv, wo, bq, bk, bv, bo, w1, b1, w2, b2, gamma, beta) = params
    wqkv = jnp.concatenate([wq, wk, wv], axis=1)    # (D, 3D)
    bqkv = jnp.concatenate([bq, bk, bv], axis=1)    # (1, 3D)
    return (wqkv, bqkv, wo, bo, w1, b1, w2, b2, gamma, beta)


# ------------------------------- wrapper ------------------------------------
@jax.jit
def encoder_block(x, packed_params):
    (wqkv, bqkv, wo, bo, w1, b1, w2, b2, gamma, beta) = packed_params

    # Fold batch into the row (sublane) dimension: (B, S, D) -> (B*S, D).
    xf = x.reshape(N, D)

    # Everything (weights + activations) is a few tens of KiB -> whole arrays
    # live in VMEM, no grid, no pipelining needed.
    vmem_spec = pl.BlockSpec(memory_space=pltpu.MemorySpace.VMEM)

    flops = (2 * N * D * 3 * D                      # fused QKV
             + B * H * (2 * S * S * DH * 2          # scores + PV
                        + 2 * S * DH * D)           # per-head Wo accumulation
             + 2 * N * D * F + 2 * N * F * D)       # FFN
    transcendentals = B * H * S * S + 2 * N         # exp + rsqrt
    bytes_accessed = 4 * (N * D * 2                 # x in + out
                          + D * 3 * D + 3 * D       # Wqkv + bqkv
                          + D * D + D               # Wo + bo
                          + D * F + F + F * D + D   # W1/b1/W2/b2
                          + 2 * D)                  # gamma, beta

    out = pl.pallas_call(
        encoder_block_kernel,
        out_shape=jax.ShapeDtypeStruct((N, D), jnp.float32),
        in_specs=[vmem_spec] * 11,
        out_specs=vmem_spec,
        cost_estimate=pl.CostEstimate(
            flops=flops,
            transcendentals=transcendentals,
            bytes_accessed=bytes_accessed),
    )(xf, wqkv, bqkv, wo, bo, w1, b1, w2, b2, gamma, beta)

    return out.reshape(B, S, D)


# ------------------------- pure-JAX reference (f32) --------------------------
def encoder_block_ref(x, params):
    (wq, wk, wv, wo, bq, bk, bv, bo, w1, b1, w2, b2, gamma, beta) = params
    hp = jax.lax.Precision.HIGHEST

    def layer_norm(v):
        mu = jnp.mean(v, axis=-1, keepdims=True)
        var = jnp.mean((v - mu) ** 2, axis=-1, keepdims=True)
        return (v - mu) * jax.lax.rsqrt(var + LN_EPS) * gamma + beta

    q = jnp.dot(x, wq, precision=hp) + bq
    k = jnp.dot(x, wk, precision=hp) + bk
    v = jnp.dot(x, wv, precision=hp) + bv
    q = q.reshape(B, S, H, DH).transpose(0, 2, 1, 3)
    k = k.reshape(B, S, H, DH).transpose(0, 2, 1, 3)
    v = v.reshape(B, S, H, DH).transpose(0, 2, 1, 3)
    s = jnp.einsum("bhqd,bhkd->bhqk", q, k, precision=hp) / math.sqrt(DH)
    p = jax.nn.softmax(s, axis=-1)
    attn = jnp.einsum("bhqk,bhkd->bhqd", p, v, precision=hp)
    attn = attn.transpose(0, 2, 1, 3).reshape(B, S, D)
    attn = jnp.dot(attn, wo, precision=hp) + bo
    y = layer_norm(x + attn)
    h1 = jnp.maximum(jnp.dot(y, w1, precision=hp) + b1, 0.0)
    ffn = jnp.dot(h1, w2, precision=hp) + b2
    return layer_norm(y + ffn)


# --------------------------------- main --------------------------------------
if __name__ == "__main__":
    key = jax.random.PRNGKey(0)
    keys = jax.random.split(key, 16)

    def init(k, shape, scale):
        return jax.random.normal(k, shape, jnp.float32) * scale

    wq = init(keys[0], (D, D), 1.0 / math.sqrt(D))
    wk = init(keys[1], (D, D), 1.0 / math.sqrt(D))
    wv = init(keys[2], (D, D), 1.0 / math.sqrt(D))
    wo = init(keys[3], (D, D), 1.0 / math.sqrt(D))
    bq = init(keys[4], (1, D), 0.02)
    bk = init(keys[5], (1, D), 0.02)
    bv = init(keys[6], (1, D), 0.02)
    bo = init(keys[7], (1, D), 0.02)
    w1 = init(keys[8], (D, F), 1.0 / math.sqrt(D))
    b1 = init(keys[9], (1, F), 0.02)
    w2 = init(keys[10], (F, D), 1.0 / math.sqrt(F))
    b2 = init(keys[11], (1, D), 0.02)
    gamma = jnp.ones((1, D), jnp.float32)
    beta = jnp.zeros((1, D), jnp.float32)

    params = (wq, wk, wv, wo, bq, bk, bv, bo, w1, b1, w2, b2, gamma, beta)
    packed = pack_params(params)   # one-time fusion, outside the jit'd call path

    x = jax.random.normal(keys[12], (B, S, D), jnp.float32)

    out = encoder_block(x, packed)
    out = jax.block_until_ready(out)

    ref = encoder_block_ref(x, params)
    assert out.shape == (B, S, D)
    # Full-f32 matmuls + exact softmax divide -> tight tolerance.
    assert jnp.allclose(out, ref, atol=1e-3, rtol=1e-3), "mismatch vs JAX reference"

    print("KERNEL_OK")
</pallas_src>

<mosaic_0001>
module attributes {stable_mosaic.version = 11 : i64} {
  func.func @encoder_block_kernel(%arg0: memref<16x32xf32, #tpu.memory_space<vmem>>, %arg1: memref<32x96xf32, #tpu.memory_space<vmem>>, %arg2: memref<1x96xf32, #tpu.memory_space<vmem>>, %arg3: memref<32x32xf32, #tpu.memory_space<vmem>>, %arg4: memref<1x32xf32, #tpu.memory_space<vmem>>, %arg5: memref<32x64xf32, #tpu.memory_space<vmem>>, %arg6: memref<1x64xf32, #tpu.memory_space<vmem>>, %arg7: memref<64x32xf32, #tpu.memory_space<vmem>>, %arg8: memref<1x32xf32, #tpu.memory_space<vmem>>, %arg9: memref<1x32xf32, #tpu.memory_space<vmem>>, %arg10: memref<1x32xf32, #tpu.memory_space<vmem>>, %arg11: memref<16x32xf32, #tpu.memory_space<vmem>>) attributes {dimension_semantics = [], scalar_prefetch = 0 : i64, scratch_operands = 0 : i64, tpu.core_type = #tpu.core_type<tc>} {
    %c0 = arith.constant 0 : index
    %c0_0 = arith.constant 0 : index
    %0 = vector.load %arg0[%c0, %c0_0] : memref<16x32xf32, #tpu.memory_space<vmem>>, vector<16x32xf32>
    %c0_1 = arith.constant 0 : index
    %c0_2 = arith.constant 0 : index
    %1 = vector.load %arg9[%c0_1, %c0_2] : memref<1x32xf32, #tpu.memory_space<vmem>>, vector<1x32xf32>
    %c0_3 = arith.constant 0 : index
    %c0_4 = arith.constant 0 : index
    %2 = vector.load %arg10[%c0_3, %c0_4] : memref<1x32xf32, #tpu.memory_space<vmem>>, vector<1x32xf32>
    %c0_5 = arith.constant 0 : index
    %c0_6 = arith.constant 0 : index
    %3 = vector.load %arg3[%c0_5, %c0_6] : memref<32x32xf32, #tpu.memory_space<vmem>>, vector<32x32xf32>
    %c0_7 = arith.constant 0 : index
    %c0_8 = arith.constant 0 : index
    %4 = vector.load %arg1[%c0_7, %c0_8] : memref<32x96xf32, #tpu.memory_space<vmem>>, vector<32x96xf32>
    %cst = arith.constant dense<0.000000e+00> : vector<16x96xf32>
    %5 = tpu.matmul %0, %4, %cst {dimension_numbers = #tpu.dot_dimension_numbers<[1], [0], [0], [1], [0, 0, 1, 1], [], []>} : vector<16x32xf32>, vector<32x96xf32>, vector<16x96xf32> -> vector<16x96xf32>
    %c0_9 = arith.constant 0 : index
    %c0_10 = arith.constant 0 : index
    %6 = vector.load %arg2[%c0_9, %c0_10] : memref<1x96xf32, #tpu.memory_space<vmem>>, vector<1x96xf32>
    %7 = vector.broadcast %6 : vector<1x96xf32> to vector<16x96xf32>
    %8 = arith.addf %5, %7 : vector<16x96xf32>
    %9 = vector.extract_strided_slice %8 {offsets = [0, 0], sizes = [16, 32], strides = [1, 1]} : vector<16x96xf32> to vector<16x32xf32>
    %cst_11 = arith.constant 0.353553385 : f32
    %10 = vector.broadcast %cst_11 : f32 to vector<16x32xf32>
    %11 = arith.mulf %9, %10 : vector<16x32xf32>
    %12 = vector.extract_strided_slice %8 {offsets = [0, 32], sizes = [16, 32], strides = [1, 1]} : vector<16x96xf32> to vector<16x32xf32>
    %13 = vector.extract_strided_slice %8 {offsets = [0, 64], sizes = [16, 32], strides = [1, 1]} : vector<16x96xf32> to vector<16x32xf32>
    %14 = vector.extract_strided_slice %11 {offsets = [0, 0], sizes = [8, 8], strides = [1, 1]} : vector<16x32xf32> to vector<8x8xf32>
    %15 = vector.extract_strided_slice %12 {offsets = [0, 0], sizes = [8, 8], strides = [1, 1]} : vector<16x32xf32> to vector<8x8xf32>
    %cst_12 = arith.constant dense<0.000000e+00> : vector<8x8xf32>
    %16 = tpu.matmul %14, %15, %cst_12 {dimension_numbers = #tpu.dot_dimension_numbers<[1], [1], [0], [0], [0, 0, 1, 0], [], []>} : vector<8x8xf32>, vector<8x8xf32>, vector<8x8xf32> -> vector<8x8xf32>
    %17 = vector.extract_strided_slice %11 {offsets = [0, 8], sizes = [8, 8], strides = [1, 1]} : vector<16x32xf32> to vector<8x8xf32>
    %18 = vector.extract_strided_slice %12 {offsets = [0, 8], sizes = [8, 8], strides = [1, 1]} : vector<16x32xf32> to vector<8x8xf32>
    %cst_13 = arith.constant dense<0.000000e+00> : vector<8x8xf32>
    %19 = tpu.matmul %17, %18, %cst_13 {dimension_numbers = #tpu.dot_dimension_numbers<[1], [1], [0], [0], [0, 0, 1, 0], [], []>} : vector<8x8xf32>, vector<8x8xf32>, vector<8x8xf32> -> vector<8x8xf32>
    %20 = vector.extract_strided_slice %11 {offsets = [0, 16], sizes = [8, 8], strides = [1, 1]} : vector<16x32xf32> to vector<8x8xf32>
    %21 = vector.extract_strided_slice %12 {offsets = [0, 16], sizes = [8, 8], strides = [1, 1]} : vector<16x32xf32> to vector<8x8xf32>
    %cst_14 = arith.constant dense<0.000000e+00> : vector<8x8xf32>
    %22 = tpu.matmul %20, %21, %cst_14 {dimension_numbers = #tpu.dot_dimension_numbers<[1], [1], [0], [0], [0, 0, 1, 0], [], []>} : vector<8x8xf32>, vector<8x8xf32>, vector<8x8xf32> -> vector<8x8xf32>
    %23 = vector.extract_strided_slice %11 {offsets = [0, 24], sizes = [8, 8], strides = [1, 1]} : vector<16x32xf32> to vector<8x8xf32>
    %24 = vector.extract_strided_slice %12 {offsets = [0, 24], sizes = [8, 8], strides = [1, 1]} : vector<16x32xf32> to vector<8x8xf32>
    %cst_15 = arith.constant dense<0.000000e+00> : vector<8x8xf32>
    %25 = tpu.matmul %23, %24, %cst_15 {dimension_numbers = #tpu.dot_dimension_numbers<[1], [1], [0], [0], [0, 0, 1, 0], [], []>} : vector<8x8xf32>, vector<8x8xf32>, vector<8x8xf32> -> vector<8x8xf32>
    %26 = vector.extract_strided_slice %11 {offsets = [8, 0], sizes = [8, 8], strides = [1, 1]} : vector<16x32xf32> to vector<8x8xf32>
    %27 = vector.extract_strided_slice %12 {offsets = [8, 0], sizes = [8, 8], strides = [1, 1]} : vector<16x32xf32> to vector<8x8xf32>
    %cst_16 = arith.constant dense<0.000000e+00> : vector<8x8xf32>
    %28 = tpu.matmul %26, %27, %cst_16 {dimension_numbers = #tpu.dot_dimension_numbers<[1], [1], [0], [0], [0, 0, 1, 0], [], []>} : vector<8x8xf32>, vector<8x8xf32>, vector<8x8xf32> -> vector<8x8xf32>
    %29 = vector.extract_strided_slice %11 {offsets = [8, 8], sizes = [8, 8], strides = [1, 1]} : vector<16x32xf32> to vector<8x8xf32>
    %30 = vector.extract_strided_slice %12 {offsets = [8, 8], sizes = [8, 8], strides = [1, 1]} : vector<16x32xf32> to vector<8x8xf32>
    %cst_17 = arith.constant dense<0.000000e+00> : vector<8x8xf32>
    %31 = tpu.matmul %29, %30, %cst_17 {dimension_numbers = #tpu.dot_dimension_numbers<[1], [1], [0], [0], [0, 0, 1, 0], [], []>} : vector<8x8xf32>, vector<8x8xf32>, vector<8x8xf32> -> vector<8x8xf32>
    %32 = vector.extract_strided_slice %11 {offsets = [8, 16], sizes = [8, 8], strides = [1, 1]} : vector<16x32xf32> to vector<8x8xf32>
    %33 = vector.extract_strided_slice %12 {offsets = [8, 16], sizes = [8, 8], strides = [1, 1]} : vector<16x32xf32> to vector<8x8xf32>
    %cst_18 = arith.constant dense<0.000000e+00> : vector<8x8xf32>
    %34 = tpu.matmul %32, %33, %cst_18 {dimension_numbers = #tpu.dot_dimension_numbers<[1], [1], [0], [0], [0, 0, 1, 0], [], []>} : vector<8x8xf32>, vector<8x8xf32>, vector<8x8xf32> -> vector<8x8xf32>
    %35 = vector.extract_strided_slice %11 {offsets = [8, 24], sizes = [8, 8], strides = [1, 1]} : vector<16x32xf32> to vector<8x8xf32>
    %36 = vector.extract_strided_slice %12 {offsets = [8, 24], sizes = [8, 8], strides = [1, 1]} : vector<16x32xf32> to vector<8x8xf32>
    %cst_19 = arith.constant dense<0.000000e+00> : vector<8x8xf32>
    %37 = tpu.matmul %35, %36, %cst_19 {dimension_numbers = #tpu.dot_dimension_numbers<[1], [1], [0], [0], [0, 0, 1, 0], [], []>} : vector<8x8xf32>, vector<8x8xf32>, vector<8x8xf32> -> vector<8x8xf32>
    %38 = tpu.concatenate %16, %19, %22, %25, %28, %31, %34, %37 in 0 : vector<8x8xf32>, vector<8x8xf32>, vector<8x8xf32>, vector<8x8xf32>, vector<8x8xf32>, vector<8x8xf32>, vector<8x8xf32>, vector<8x8xf32> -> vector<64x8xf32>
    %cst_20 = arith.constant dense<0xFF800000> : vector<64xf32>
    %39 = vector.multi_reduction <maximumf>, %38, %cst_20 [1] : vector<64x8xf32> to vector<64xf32>
    %40 = vector.shape_cast %39 : vector<64xf32> to vector<64x1xf32>
    %41 = vector.broadcast %40 : vector<64x1xf32> to vector<64x8xf32>
    %42 = arith.subf %38, %41 : vector<64x8xf32>
    %43 = math.exp %42 : vector<64x8xf32>
    %cst_21 = arith.constant dense<0.000000e+00> : vector<64xf32>
    %44 = vector.multi_reduction <add>, %43, %cst_21 [1] : vector<64x8xf32> to vector<64xf32>
    %45 = vector.shape_cast %44 : vector<64xf32> to vector<64x1xf32>
    %46 = vector.broadcast %45 : vector<64x1xf32> to vector<64x8xf32>
    %47 = arith.divf %43, %46 : vector<64x8xf32>
    %cst_22 = arith.constant 0.000000e+00 : f32
    %48 = vector.broadcast %cst_22 : f32 to vector<8x32xf32>
    %49 = vector.extract_strided_slice %47 {offsets = [0, 0], sizes = [8, 8], strides = [1, 1]} : vector<64x8xf32> to vector<8x8xf32>
    %50 = vector.extract_strided_slice %13 {offsets = [0, 0], sizes = [8, 8], strides = [1, 1]} : vector<16x32xf32> to vector<8x8xf32>
    %cst_23 = arith.constant dense<0.000000e+00> : vector<8x8xf32>
    %51 = tpu.matmul %49, %50, %cst_23 {dimension_numbers = #tpu.dot_dimension_numbers<[1], [0], [0], [1], [0, 0, 1, 1], [], []>} : vector<8x8xf32>, vector<8x8xf32>, vector<8x8xf32> -> vector<8x8xf32>
    %52 = vector.extract_strided_slice %3 {offsets = [0, 0], sizes = [8, 32], strides = [1, 1]} : vector<32x32xf32> to vector<8x32xf32>
    %cst_24 = arith.constant dense<0.000000e+00> : vector<8x32xf32>
    %53 = tpu.matmul %51, %52, %cst_24 {dimension_numbers = #tpu.dot_dimension_numbers<[1], [0], [0], [1], [0, 0, 1, 1], [], []>} : vector<8x8xf32>, vector<8x32xf32>, vector<8x32xf32> -> vector<8x32xf32>
    %54 = arith.addf %48, %53 : vector<8x32xf32>
    %55 = vector.extract_strided_slice %47 {offsets = [8, 0], sizes = [8, 8], strides = [1, 1]} : vector<64x8xf32> to vector<8x8xf32>
    %56 = vector.extract_strided_slice %13 {offsets = [0, 8], sizes = [8, 8], strides = [1, 1]} : vector<16x32xf32> to vector<8x8xf32>
    %cst_25 = arith.constant dense<0.000000e+00> : vector<8x8xf32>
    %57 = tpu.matmul %55, %56, %cst_25 {dimension_numbers = #tpu.dot_dimension_numbers<[1], [0], [0], [1], [0, 0, 1, 1], [], []>} : vector<8x8xf32>, vector<8x8xf32>, vector<8x8xf32> -> vector<8x8xf32>
    %58 = vector.extract_strided_slice %3 {offsets = [8, 0], sizes = [8, 32], strides = [1, 1]} : vector<32x32xf32> to vector<8x32xf32>
    %cst_26 = arith.constant dense<0.000000e+00> : vector<8x32xf32>
    %59 = tpu.matmul %57, %58, %cst_26 {dimension_numbers = #tpu.dot_dimension_numbers<[1], [0], [0], [1], [0, 0, 1, 1], [], []>} : vector<8x8xf32>, vector<8x32xf32>, vector<8x32xf32> -> vector<8x32xf32>
    %60 = arith.addf %54, %59 : vector<8x32xf32>
    %61 = vector.extract_strided_slice %47 {offsets = [16, 0], sizes = [8, 8], strides = [1, 1]} : vector<64x8xf32> to vector<8x8xf32>
    %62 = vector.extract_strided_slice %13 {offsets = [0, 16], sizes = [8, 8], strides = [1, 1]} : vector<16x32xf32> to vector<8x8xf32>
    %cst_27 = arith.constant dense<0.000000e+00> : vector<8x8xf32>
    %63 = tpu.matmul %61, %62, %cst_27 {dimension_numbers = #tpu.dot_dimension_numbers<[1], [0], [0], [1], [0, 0, 1, 1], [], []>} : vector<8x8xf32>, vector<8x8xf32>, vector<8x8xf32> -> vector<8x8xf32>
    %64 = vector.extract_strided_slice %3 {offsets = [16, 0], sizes = [8, 32], strides = [1, 1]} : vector<32x32xf32> to vector<8x32xf32>
    %cst_28 = arith.constant dense<0.000000e+00> : vector<8x32xf32>
    %65 = tpu.matmul %63, %64, %cst_28 {dimension_numbers = #tpu.dot_dimension_numbers<[1], [0], [0], [1], [0, 0, 1, 1], [], []>} : vector<8x8xf32>, vector<8x32xf32>, vector<8x32xf32> -> vector<8x32xf32>
    %66 = arith.addf %60, %65 : vector<8x32xf32>
    %67 = vector.extract_strided_slice %47 {offsets = [24, 0], sizes = [8, 8], strides = [1, 1]} : vector<64x8xf32> to vector<8x8xf32>
    %68 = vector.extract_strided_slice %13 {offsets = [0, 24], sizes = [8, 8], strides = [1, 1]} : vector<16x32xf32> to vector<8x8xf32>
    %cst_29 = arith.constant dense<0.000000e+00> : vector<8x8xf32>
    %69 = tpu.matmul %67, %68, %cst_29 {dimension_numbers = #tpu.dot_dimension_numbers<[1], [0], [0], [1], [0, 0, 1, 1], [], []>} : vector<8x8xf32>, vector<8x8xf32>, vector<8x8xf32> -> vector<8x8xf32>
    %70 = vector.extract_strided_slice %3 {offsets = [24, 0], sizes = [8, 32], strides = [1, 1]} : vector<32x32xf32> to vector<8x32xf32>
    %cst_30 = arith.constant dense<0.000000e+00> : vector<8x32xf32>
    %71 = tpu.matmul %69, %70, %cst_30 {dimension_numbers = #tpu.dot_dimension_numbers<[1], [0], [0], [1], [0, 0, 1, 1], [], []>} : vector<8x8xf32>, vector<8x32xf32>, vector<8x32xf32> -> vector<8x32xf32>
    %72 = arith.addf %66, %71 : vector<8x32xf32>
    %cst_31 = arith.constant 0.000000e+00 : f32
    %73 = vector.broadcast %cst_31 : f32 to vector<8x32xf32>
    %74 = vector.extract_strided_slice %47 {offsets = [32, 0], sizes = [8, 8], strides = [1, 1]} : vector<64x8xf32> to vector<8x8xf32>
    %75 = vector.extract_strided_slice %13 {offsets = [8, 0], sizes = [8, 8], strides = [1, 1]} : vector<16x32xf32> to vector<8x8xf32>
    %cst_32 = arith.constant dense<0.000000e+00> : vector<8x8xf32>
    %76 = tpu.matmul %74, %75, %cst_32 {dimension_numbers = #tpu.dot_dimension_numbers<[1], [0], [0], [1], [0, 0, 1, 1], [], []>} : vector<8x8xf32>, vector<8x8xf32>, vector<8x8xf32> -> vector<8x8xf32>
    %77 = vector.extract_strided_slice %3 {offsets = [0, 0], sizes = [8, 32], strides = [1, 1]} : vector<32x32xf32> to vector<8x32xf32>
    %cst_33 = arith.constant dense<0.000000e+00> : vector<8x32xf32>
    %78 = tpu.matmul %76, %77, %cst_33 {dimension_numbers = #tpu.dot_dimension_numbers<[1], [0], [0], [1], [0, 0, 1, 1], [], []>} : vector<8x8xf32>, vector<8x32xf32>, vector<8x32xf32> -> vector<8x32xf32>
    %79 = arith.addf %73, %78 : vector<8x32xf32>
    %80 = vector.extract_strided_slice %47 {offsets = [40, 0], sizes = [8, 8], strides = [1, 1]} : vector<64x8xf32> to vector<8x8xf32>
    %81 = vector.extract_strided_slice %13 {offsets = [8, 8], sizes = [8, 8], strides = [1, 1]} : vector<16x32xf32> to vector<8x8xf32>
    %cst_34 = arith.constant dense<0.000000e+00> : vector<8x8xf32>
    %82 = tpu.matmul %80, %81, %cst_34 {dimension_numbers = #tpu.dot_dimension_numbers<[1], [0], [0], [1], [0, 0, 1, 1], [], []>} : vector<8x8xf32>, vector<8x8xf32>, vector<8x8xf32> -> vector<8x8xf32>
    %83 = vector.extract_strided_slice %3 {offsets = [8, 0], sizes = [8, 32], strides = [1, 1]} : vector<32x32xf32> to vector<8x32xf32>
    %cst_35 = arith.constant dense<0.000000e+00> : vector<8x32xf32>
    %84 = tpu.matmul %82, %83, %cst_35 {dimension_numbers = #tpu.dot_dimension_numbers<[1], [0], [0], [1], [0, 0, 1, 1], [], []>} : vector<8x8xf32>, vector<8x32xf32>, vector<8x32xf32> -> vector<8x32xf32>
    %85 = arith.addf %79, %84 : vector<8x32xf32>
    %86 = vector.extract_strided_slice %47 {offsets = [48, 0], sizes = [8, 8], strides = [1, 1]} : vector<64x8xf32> to vector<8x8xf32>
    %87 = vector.extract_strided_slice %13 {offsets = [8, 16], sizes = [8, 8], strides = [1, 1]} : vector<16x32xf32> to vector<8x8xf32>
    %cst_36 = arith.constant dense<0.000000e+00> : vector<8x8xf32>
    %88 = tpu.matmul %86, %87, %cst_36 {dimension_numbers = #tpu.dot_dimension_numbers<[1], [0], [0], [1], [0, 0, 1, 1], [], []>} : vector<8x8xf32>, vector<8x8xf32>, vector<8x8xf32> -> vector<8x8xf32>
    %89 = vector.extract_strided_slice %3 {offsets = [16, 0], sizes = [8, 32], strides = [1, 1]} : vector<32x32xf32> to vector<8x32xf32>
    %cst_37 = arith.constant dense<0.000000e+00> : vector<8x32xf32>
    %90 = tpu.matmul %88, %89, %cst_37 {dimension_numbers = #tpu.dot_dimension_numbers<[1], [0], [0], [1], [0, 0, 1, 1], [], []>} : vector<8x8xf32>, vector<8x32xf32>, vector<8x32xf32> -> vector<8x32xf32>
    %91 = arith.addf %85, %90 : vector<8x32xf32>
    %92 = vector.extract_strided_slice %47 {offsets = [56, 0], sizes = [8, 8], strides = [1, 1]} : vector<64x8xf32> to vector<8x8xf32>
    %93 = vector.extract_strided_slice %13 {offsets = [8, 24], sizes = [8, 8], strides = [1, 1]} : vector<16x32xf32> to vector<8x8xf32>
    %cst_38 = arith.constant dense<0.000000e+00> : vector<8x8xf32>
    %94 = tpu.matmul %92, %93, %cst_38 {dimension_numbers = #tpu.dot_dimension_numbers<[1], [0], [0], [1], [0, 0, 1, 1], [], []>} : vector<8x8xf32>, vector<8x8xf32>, vector<8x8xf32> -> vector<8x8xf32>
    %95 = vector.extract_strided_slice %3 {offsets = [24, 0], sizes = [8, 32], strides = [1, 1]} : vector<32x32xf32> to vector<8x32xf32>
    %cst_39 = arith.constant dense<0.000000e+00> : vector<8x32xf32>
    %96 = tpu.matmul %94, %95, %cst_39 {dimension_numbers = #tpu.dot_dimension_numbers<[1], [0], [0], [1], [0, 0, 1, 1], [], []>} : vector<8x8xf32>, vector<8x32xf32>, vector<8x32xf32> -> vector<8x32xf32>
    %97 = arith.addf %91, %96 : vector<8x32xf32>
    %98 = tpu.concatenate %72, %97 in 0 : vector<8x32xf32>, vector<8x32xf32> -> vector<16x32xf32>
    %c0_40 = arith.constant 0 : index
    %c0_41 = arith.constant 0 : index
    %99 = vector.load %arg4[%c0_40, %c0_41] : memref<1x32xf32, #tpu.memory_space<vmem>>, vector<1x32xf32>
    %100 = vector.broadcast %99 : vector<1x32xf32> to vector<16x32xf32>
    %101 = arith.addf %98, %100 : vector<16x32xf32>
    %102 = arith.addf %0, %101 : vector<16x32xf32>
    %cst_42 = arith.constant dense<0.000000e+00> : vector<16xf32>
    %103 = vector.multi_reduction <add>, %102, %cst_42 [1] : vector<16x32xf32> to vector<16xf32>
    %104 = vector.shape_cast %103 : vector<16xf32> to vector<16x1xf32>
    %cst_43 = arith.constant 3.200000e+01 : f32
    %105 = vector.broadcast %cst_43 : f32 to vector<16x1xf32>
    %106 = arith.divf %104, %105 : vector<16x1xf32>
    %107 = vector.broadcast %106 : vector<16x1xf32> to vector<16x32xf32>
    %108 = arith.subf %102, %107 : vector<16x32xf32>
    %109 = arith.mulf %108, %108 : vector<16x32xf32>
    %cst_44 = arith.constant dense<0.000000e+00> : vector<16xf32>
    %110 = vector.multi_reduction <add>, %109, %cst_44 [1] : vector<16x32xf32> to vector<16xf32>
    %111 = vector.shape_cast %110 : vector<16xf32> to vector<16x1xf32>
    %cst_45 = arith.constant 3.200000e+01 : f32
    %112 = vector.broadcast %cst_45 : f32 to vector<16x1xf32>
    %113 = arith.divf %111, %112 : vector<16x1xf32>
    %114 = vector.broadcast %106 : vector<16x1xf32> to vector<16x32xf32>
    %115 = arith.subf %102, %114 : vector<16x32xf32>
    %cst_46 = arith.constant 9.99999974E-6 : f32
    %116 = vector.broadcast %cst_46 : f32 to vector<16x1xf32>
    %117 = arith.addf %113, %116 : vector<16x1xf32>
    %118 = math.rsqrt %117 : vector<16x1xf32>
    %119 = vector.broadcast %118 : vector<16x1xf32> to vector<16x32xf32>
    %120 = arith.mulf %115, %119 : vector<16x32xf32>
    %121 = vector.broadcast %1 : vector<1x32xf32> to vector<16x32xf32>
    %122 = arith.mulf %120, %121 : vector<16x32xf32>
    %123 = vector.broadcast %2 : vector<1x32xf32> to vector<16x32xf32>
    %124 = arith.addf %122, %123 : vector<16x32xf32>
    %c0_47 = arith.constant 0 : index
    %c0_48 = arith.constant 0 : index
    %125 = vector.load %arg5[%c0_47, %c0_48] : memref<32x64xf32, #tpu.memory_space<vmem>>, vector<32x64xf32>
    %cst_49 = arith.constant dense<0.000000e+00> : vector<16x64xf32>
    %126 = tpu.matmul %124, %125, %cst_49 {dimension_numbers = #tpu.dot_dimension_numbers<[1], [0], [0], [1], [0, 0, 1, 1], [], []>} : vector<16x32xf32>, vector<32x64xf32>, vector<16x64xf32> -> vector<16x64xf32>
    %c0_50 = arith.constant 0 : index
    %c0_51 = arith.constant 0 : index
    %127 = vector.load %arg6[%c0_50, %c0_51] : memref<1x64xf32, #tpu.memory_space<vmem>>, vector<1x64xf32>
    %128 = vector.broadcast %127 : vector<1x64xf32> to vector<16x64xf32>
    %129 = arith.addf %126, %128 : vector<16x64xf32>
    %cst_52 = arith.constant 0.000000e+00 : f32
    %130 = vector.broadcast %cst_52 : f32 to vector<16x64xf32>
    %131 = arith.maximumf %129, %130 : vector<16x64xf32>
    %c0_53 = arith.constant 0 : index
    %c0_54 = arith.constant 0 : index
    %132 = vector.load %arg7[%c0_53, %c0_54] : memref<64x32xf32, #tpu.memory_space<vmem>>, vector<64x32xf32>
    %cst_55 = arith.constant dense<0.000000e+00> : vector<16x32xf32>
    %133 = tpu.matmul %131, %132, %cst_55 {dimension_numbers = #tpu.dot_dimension_numbers<[1], [0], [0], [1], [0, 0, 1, 1], [], []>} : vector<16x64xf32>, vector<64x32xf32>, vector<16x32xf32> -> vector<16x32xf32>
    %c0_56 = arith.constant 0 : index
    %c0_57 = arith.constant 0 : index
    %134 = vector.load %arg8[%c0_56, %c0_57] : memref<1x32xf32, #tpu.memory_space<vmem>>, vector<1x32xf32>
    %135 = vector.broadcast %134 : vector<1x32xf32> to vector<16x32xf32>
    %136 = arith.addf %133, %135 : vector<16x32xf32>
    %137 = arith.addf %124, %136 : vector<16x32xf32>
    %cst_58 = arith.constant dense<0.000000e+00> : vector<16xf32>
    %138 = vector.multi_reduction <add>, %137, %cst_58 [1] : vector<16x32xf32> to vector<16xf32>
    %139 = vector.shape_cast %138 : vector<16xf32> to vector<16x1xf32>
    %cst_59 = arith.constant 3.200000e+01 : f32
    %140 = vector.broadcast %cst_59 : f32 to vector<16x1xf32>
    %141 = arith.divf %139, %140 : vector<16x1xf32>
    %142 = vector.broadcast %141 : vector<16x1xf32> to vector<16x32xf32>
    %143 = arith.subf %137, %142 : vector<16x32xf32>
    %144 = arith.mulf %143, %143 : vector<16x32xf32>
    %cst_60 = arith.constant dense<0.000000e+00> : vector<16xf32>
    %145 = vector.multi_reduction <add>, %144, %cst_60 [1] : vector<16x32xf32> to vector<16xf32>
    %146 = vector.shape_cast %145 : vector<16xf32> to vector<16x1xf32>
    %cst_61 = arith.constant 3.200000e+01 : f32
    %147 = vector.broadcast %cst_61 : f32 to vector<16x1xf32>
    %148 = arith.divf %146, %147 : vector<16x1xf32>
    %149 = vector.broadcast %141 : vector<16x1xf32> to vector<16x32xf32>
    %150 = arith.subf %137, %149 : vector<16x32xf32>
    %cst_62 = arith.constant 9.99999974E-6 : f32
    %151 = vector.broadcast %cst_62 : f32 to vector<16x1xf32>
    %152 = arith.addf %148, %151 : vector<16x1xf32>
    %153 = math.rsqrt %152 : vector<16x1xf32>
    %154 = vector.broadcast %153 : vector<16x1xf32> to vector<16x32xf32>
    %155 = arith.mulf %150, %154 : vector<16x32xf32>
    %156 = vector.broadcast %1 : vector<1x32xf32> to vector<16x32xf32>
    %157 = arith.mulf %155, %156 : vector<16x32xf32>
    %158 = vector.broadcast %2 : vector<1x32xf32> to vector<16x32xf32>
    %159 = arith.addf %157, %158 : vector<16x32xf32>
    %c0_63 = arith.constant 0 : index
    %c0_64 = arith.constant 0 : index
    %160 = vector.load %arg11[%c0_63, %c0_64] : memref<16x32xf32, #tpu.memory_space<vmem>>, vector<16x32xf32>
    tpu.vector_store %arg11[%c0_63, %c0_64], %159 {strides = array<i32>} : memref<16x32xf32, #tpu.memory_space<vmem>>, vector<16x32xf32>,
    return
  }
}

</mosaic_0001>

<bundles_post_ra>
// kernel: encoder_block.1
= control target key start
LH: loop header
LB: loop body
LE: loop exit
PB: predicated region body
PF: predicated region fallthrough
CT: control target
= control target key end

     0   :  { %16 = vsyncpa [#allocation3], 0  ;;  %s3139_s0 = inlined_call_operand.hbm [shape: f32[16,32], index: 0, kind: input, shape index: {}]   ;;  %s3140_s1 = inlined_call_operand.vmem [shape: f32[32,96], index: 1, kind: input, shape index: {}]   ;;  %s3141_s2 = inlined_call_operand.vmem [shape: f32[1,96], index: 2, kind: input, shape index: {}]   ;;  %s3142_s3 = inlined_call_operand.vmem [shape: f32[32,32], index: 3, kind: input, shape index: {}]   ;;  %s3143_s4 = inlined_call_operand.vmem [shape: f32[1,32], index: 4, kind: input, shape index: {}]   ;;  %s3144_s5 = inlined_call_operand.vmem [shape: f32[32,64], index: 5, kind: input, shape index: {}]   ;;  %s3145_s6 = inlined_call_operand.vmem [shape: f32[1,64], index: 6, kind: input, shape index: {}]   ;;  %s3146_s7 = inlined_call_operand.vmem [shape: f32[64,32], index: 7, kind: input, shape index: {}]   ;;  %s3147_s8 = inlined_call_operand.vmem [shape: f32[1,32], index: 8, kind: input, shape index: {}]   ;;  %s3148_s9 = inlined_call_operand.vmem [shape: f32[1,32], index: 9, kind: input, shape index: {}]   ;;  %s3149_s10 = inlined_call_operand.vmem [shape: f32[1,32], index: 10, kind: input, shape index: {}]   ;;  %s3150_s11 = inlined_call_operand.hbm [shape: f32[16,32], index: 11, kind: output, shape index: {}]  }
   0x1   :  { %17 = vsyncpa [#allocation4], 0  ;;  %s2737_s17 = smov [#allocation2]  }
   0x2   :  { %s23_s18 = sshll.u32 %s2737_s17, 4  ;;  %s24_s18 = int_to_ptr.vmem [resolvable:$true] %s23_s18 }
   0x3   :  { %s2701_s19 = scalar_lea.vmem %s24_s18, 256  ;;  %p2706_p1 = scmp.lt.s32.totalorder %s24_s18, %s24_s18 }
   0x4   :  { %p2702_p0 = scmp.ne.s32.totalorder %s24_s18, %s2701_s19  ;;  %p2707_p2 = scmp.lt.s32.totalorder %s2701_s19, %s2701_s19 }
   0x6   :  { %p2708_p3 = por %p2707_p2, %p2706_p1 }
   0x8   :  { %p2709_p4 = pnand %p2708_p3, %p2702_p0 }
   0xa   :  { %2712 = shalt.err (!%p2709_p4)
}
   0xb   :  { %s2738_s20 = smov 128   ;;  %s2739_s21 = smov 8  }
   0xc   :  { %29 = dma.hbm_to_vmem [thread:$0]  %s3139_s0, 256, %s24_s18, [#allocation3], %s2738_s20, %s2738_s20, %s2739_s21  }
   0xd   :  { %2733 = dma.done.wait [#allocation3], 256  }
   0xe   :  { %2734 = vsyncadd [#allocation3], 4294967040  ;;  %vm72_vm0 = vcmask 261120   ;;  %v64_v0 = vld [vmem:[%s3140_s1 + $0x18] sm:$0xff]  ;;  %v63_v1 = vld [vmem:[%s3140_s1 + $0x10] sm:$0xff]  ;;  %v2740_v6 = vmov 0.0  }
   0xf   :  { %2475 = vmatprep.subr.mxu0 %v64_v0  ;;  %v2826_v2 = vld [vmem:[#allocation2] sm:$0xff]  ;;  %v62_v3 = vld [vmem:[%s3140_s1 + $0x8] sm:$0xff]  ;;  %2491 = vmatprep.subr.mxu1 %v2740_v6  ;;  %vm2741_vm1 = vmmov 0   ;;  %s2742_s13 = smov 96   ;;  %s2743_s14 = smov 88   ;;  %vm159_vm2 = vcmask 64512  }
  0x10   :  { %2476 = vmatpush3.msra.mxu0 %v64_v0  ;;  %2483 = vmatprep.mubr.msk.f32.mxu0 %vm72_vm0, %v2826_v2  ;;  %v61_v4 = vld [vmem:[%s3140_s1] sm:$0xff]  ;;  %v2836_v5 = vld [vmem:[#allocation2 + $0x8] sm:$0xff]  ;;  %s2744_s15 = smov 80   ;;  %s2745_s16 = smov 120   ;;  %vm2228_vm3 = vcmask 523264  }
  0x11   :  { %2477 = vmatprep.subr.mxu0 %v63_v1  ;;  %2493 = vmatprep.mubr.msk.f32.mxu1 %vm2741_vm1, %v2740_v6  ;;  %v2361_v8 = vld [vmem:[%s3141_s2] ss:$0 sm:$0xff]  ;;  %s2746_s2 = smov 72   ;;  %s2747_s17 = smov 112  }
  0x12   :  { %2478 = vmatpush3.msra.mxu0 %v63_v1  ;;  %s2748_s18 = smov 104   ;;  %s2749_s19 = smov 56  }
  0x13   :  { %2479 = vmatprep.subr.mxu0 %v62_v3  ;;  %s2750_s22 = smov 64   ;;  %s2751_s23 = smov 40  }
  0x14   :  { %2480 = vmatpush3.msra.mxu0 %v62_v3  ;;  %s2752_s24 = smov 48  }
  0x15   :  { %2481 = vmatprep.subr.mxu0 %v61_v4 }
  0x16   :  { %2482 = vmatpush3.msra.mxu0 %v61_v4 }
  0x17   :  { %2484 = vmatmul.mubr.msk.f32.vlgmr.msra.gmra.mxu0 %vm72_vm0, %v2836_v5  ;;  %2486 = vmatprep.subr.mxu0 %v2740_v6 }
  0x18   :  { %2488 = vmatprep.mubr.msk.f32.mxu0 %vm2741_vm1, %v2740_v6 }
  0xd7   :  { %v2485_v7 = vpop.f32.mrf.mxu0 }
  0xd8   :  { %v2862_v12 = vadd.f32 %v2485_v7, %v2361_v8 }
  0xd9   :  { %v145_v9 = vpop.f32.mrf.mxu0 }
  0xda   :  { %v2849_v10 = vadd.f32 %v2361_v8, %v145_v9  ;;  %v155_v30 = vmul.f32 0.35355338, %v2862_v12 }
  0xdc   :  { %157 = vrot.lane.b32.xlu1 %v2849_v10, %s2742_s13  ;;  %237 = vrot.lane.b32.xlu0 %v2849_v10, %s2743_s14  ;;  %v154_v11 = vmul.f32 0.35355338, %v2849_v10 }
  0xe0   :  { %315 = vrot.lane.b32.xlu1 %v2849_v10, %s2744_s15  ;;  %235 = vrot.lane.b32.xlu0 %v154_v11, %s2745_s16 }
  0xe4   :  { %393 = vrot.lane.b32.xlu1 %v2849_v10, %s2746_s2  ;;  %313 = vrot.lane.b32.xlu0 %v154_v11, %s2747_s17 }
  0xe8   :  { %391 = vrot.lane.b32.xlu0 %v154_v11, %s2748_s18 }
  0xec   :  { %549 = vrot.lane.b32.xlu0 %v2862_v12, %s2743_s14 }
 0x14e   :  { %v158_v13 = vpop.permute.xlu1 %157  ;;  %v238_v14 = vpop.permute.xlu0 %237 }
 0x14f   :  { %2487 = vmatpush3.xpose.msk.msra.mxu0 %vm159_vm2, %v158_v13  ;;  %2492 = vmatpush3.xpose.msk.msra.mxu1 %vm159_vm2, %v238_v14 }
 0x150   :  { %2496 = vmatprep.subr.mxu0 %v2740_v6  ;;  %2501 = vmatprep.subr.mxu1 %v2740_v6 }
 0x152   :  { %v316_v15 = vpop.permute.xlu1 %315  ;;  %v236_v16 = vpop.permute.xlu0 %235  ;;  %2489 = vmatmul.mubr.msk.f32.vlgmr.msra.gmra.mxu0 %vm159_vm2, %v154_v11 }
 0x153   :  { %2494 = vmatmul.mubr.msk.f32.vlgmr.msra.gmra.mxu1 %vm159_vm2, %v236_v16  ;;  %2497 = vmatpush3.xpose.msk.msra.mxu0 %vm159_vm2, %v316_v15 }
 0x154   :  { %2498 = vmatprep.mubr.msk.f32.mxu0 %vm2741_vm1, %v2740_v6  ;;  %2503 = vmatprep.mubr.msk.f32.mxu1 %vm2741_vm1, %v2740_v6 }
 0x155   :  { %2506 = vmatprep.subr.mxu0 %v2740_v6 }
 0x156   :  { %v394_v17 = vpop.permute.xlu1 %393  ;;  %v314_v18 = vpop.permute.xlu0 %313 }
 0x157   :  { %2499 = vmatmul.mubr.msk.f32.vlgmr.msra.gmra.mxu0 %vm159_vm2, %v314_v18  ;;  %2502 = vmatpush3.xpose.msk.msra.mxu1 %vm159_vm2, %v394_v17 }
 0x158   :  { %2511 = vmatprep.subr.mxu1 %v2740_v6  ;;  %2508 = vmatprep.mubr.msk.f32.mxu0 %vm2741_vm1, %v2740_v6 }
 0x15a   :  { %v392_v19 = vpop.permute.xlu0 %391 }
 0x15b   :  { %2504 = vmatmul.mubr.msk.f32.vlgmr.msra.gmra.mxu1 %vm159_vm2, %v392_v19  ;;  %v2960_v19 = vld [vmem:[%s3142_s3 + $0x8] sm:$0xff] }
 0x15c   :  { %2513 = vmatprep.mubr.msk.f32.mxu1 %vm2741_vm1, %v2740_v6 }
 0x15e   :  { %v550_v20 = vpop.permute.xlu0 %549 }
 0x15f   :  { %2512 = vmatpush3.xpose.msk.msra.mxu1 %vm159_vm2, %v550_v20 }
 0x160   :  { %2521 = vmatprep.subr.mxu1 %v2740_v6 }
 0x212   :  { %v2887_v21 = vpop.f32.mrf.mxu0 }
 0x213   :  { %v309_v22 = vpop.f32.mrf.mxu1  ;;  %v781_v44 = vsel %vm159_vm2, %v2887_v21, -inf }
 0x214   :  { %v2490_v23 = vpop.f32.mrf.mxu0  ;;  %v784_v24 = vsel %vm159_vm2, %v309_v22, -inf }
 0x215   :  { %785 = vmax.xlane.f32.xlu1 %v784_v24  ;;  %v2495_v25 = vpop.f32.mrf.mxu1 }
 0x217   :  { %v387_v26 = vpop.f32.mrf.mxu0 }
 0x218   :  { %v787_v31 = vsel %vm159_vm2, %v387_v26, -inf }
 0x219   :  { %v2500_v27 = vpop.f32.mrf.mxu0 }
 0x21b   :  { %v2890_v28 = vpop.f32.mrf.mxu1 }
 0x21c   :  { %v790_v45 = vsel %vm159_vm2, %v2890_v28, -inf }
 0x21d   :  { %v2505_v29 = vpop.f32.mrf.mxu1 }
 0x226   :  { %547 = vrot.lane.b32.xlu1 %v155_v30, %s2745_s16 }
 0x22a   :  { %705 = vrot.lane.b32.xlu1 %v2862_v12, %s2746_s2 }
 0x22e   :  { %945 = vrot.lane.b32.xlu1 %v2849_v10, %s2749_s19 }
 0x252   :  { %788 = vmax.xlane.f32.xlu1 %v787_v31 }
 0x263   :  { %470 = vrot.lane.b32.xlu1 %v2862_v12, %s2742_s13 }
 0x267   :  { %625 = vrot.lane.b32.xlu1 %v155_v30, %s2747_s17 }
 0x26b   :  { %869 = vrot.lane.b32.xlu1 %v2849_v10, %s2750_s22 }
 0x29e   :  { %v786_v32 = vpop.xlane.xlu1 %785 }
 0x29f   :  { %v806_v33 = vsub.f32 %v309_v22, %v786_v32 }
 0x2a1   :  { %v815_v34 = vmul.f32 1.442695, %v806_v33 }
 0x2a2   :  { %v548_v35 = vpop.permute.xlu1 %547 }
 0x2a3   :  { %2653 = vpow2.f32 %v815_v34  ;;  %2514 = vmatmul.mubr.msk.f32.vlgmr.msra.gmra.mxu1 %vm159_vm2, %v548_v35  ;;  %v57_v34 = vld [vmem:[%s3142_s3] sm:$0xff] }
 0x2a4   :  { %2523 = vmatprep.mubr.msk.f32.mxu1 %vm2741_vm1, %v2740_v6 }
 0x2a6   :  { %v706_v36 = vpop.permute.xlu1 %705 }
 0x2a7   :  { %2522 = vmatpush3.xpose.msk.msra.mxu1 %vm159_vm2, %v706_v36 }
 0x2a8   :  { %2531 = vmatprep.subr.mxu1 %v2740_v6 }
 0x2aa   :  { %v946_v39 = vpop.permute.xlu1 %945 }
 0x2b0   :  { %v2654_v37 = vpop.eup %2653 }
 0x2b1   :  { %v832_v38 = vsel %vm159_vm2, %v2654_v37, 0.0 }
 0x2b2   :  { %833 = vadd.xlane.f32.xlu0 %v832_v38 }
 0x2c8   :  { %703 = vrot.lane.b32.xlu0 %v155_v30, %s2748_s18 }
 0x2db   :  { %v789_v40 = vpop.xlane.xlu1 %788 }
 0x2dc   :  { %v807_v41 = vsub.f32 %v387_v26, %v789_v40 }
 0x2de   :  { %v817_v42 = vmul.f32 1.442695, %v807_v41 }
 0x2df   :  { %v471_v43 = vpop.permute.xlu1 %470 }
 0x2e0   :  { %2655 = vpow2.f32 %v817_v42  ;;  %2507 = vmatpush3.xpose.msk.msra.mxu0 %vm159_vm2, %v471_v43  ;;  %v3005_v43 = vld [vmem:[%s3142_s3 + $0x18] sm:$0xff] }
 0x2e1   :  { %2516 = vmatprep.subr.mxu0 %v2740_v6 }
 0x2e3   :  { %2509 = vmatmul.mubr.msk.f32.vlgmr.msra.gmra.mxu0 %vm159_vm2, %v155_v30  ;;  %v626_v59 = vpop.permute.xlu1 %625 }
 0x2e4   :  { %2518 = vmatprep.mubr.msk.f32.mxu0 %vm2741_vm1, %v2740_v6 }
 0x2e7   :  { %782 = vmax.xlane.f32.xlu0 %v781_v44  ;;  %v870_v62 = vpop.permute.xlu1 %869 }
 0x2eb   :  { %791 = vmax.xlane.f32.xlu0 %v790_v45 }
 0x2ed   :  { %v2920_v46 = vpop.eup %2655 }
 0x2ee   :  { %v835_v47 = vsel %vm159_vm2, %v2920_v46, 0.0 }
 0x2ef   :  { %836 = vadd.xlane.f32.xlu1 %v835_v47 }
 0x300   :  { %1317 = vrot.lane.b32.xlu1 %v2849_v10, %s2751_s23 }
 0x301   :  { %627 = vrot.lane.b32.xlu0 %v2862_v12, %s2744_s15 }
 0x33b   :  { %v834_v48 = vpop.xlane.xlu0 %833 }
 0x33c   :  { %2657 = vrcp.f32 %v834_v48 }
 0x33f   :  { %v704_v49 = vpop.permute.xlu0 %703 }
 0x340   :  { %2524 = vmatmul.mubr.msk.f32.vlgmr.msra.gmra.mxu1 %vm159_vm2, %v704_v49 }
 0x341   :  { %2532 = vmatpush3.msra.mxu1 %v946_v39  ;;  %2533 = vmatprep.mubr.msk.f32.mxu1 %vm2741_vm1, %v2740_v6 }
 0x342   :  { %2541 = vmatprep.subr.mxu1 %v2740_v6 }
 0x349   :  { %v2658_v50 = vpop.eup %2657 }
 0x34a   :  { %v856_v51 = vmul.f32 %v2658_v50, %v2654_v37  ;;  %v2993_v37 = vld [vmem:[%s3142_s3 + $0x10] sm:$0xff] }
 0x34c   :  { %2534 = vmatmul.mubr.msk.f32.vlgmr.msra.gmra.mxu1 %vm159_vm2, %v856_v51 }
 0x34d   :  { %2543 = vmatprep.mubr.msk.f32.mxu1 %vm2741_vm1, %v2740_v6  ;;  %2542 = vmatpush3.msra.mxu1 %v57_v34 }
 0x34e   :  { %2551 = vmatprep.subr.mxu1 %v2740_v6 }
 0x363   :  { %v2935_v52 = vpop.f32.mrf.mxu1 }
 0x364   :  { %v796_v8 = vsel %vm159_vm2, %v2935_v52, -inf }
 0x365   :  { %v2515_v53 = vpop.f32.mrf.mxu1 }
 0x370   :  { %v783_v54 = vpop.xlane.xlu0 %782 }
 0x371   :  { %v805_v55 = vsub.f32 %v2887_v21, %v783_v54 }
 0x373   :  { %v813_v56 = vmul.f32 1.442695, %v805_v55 }
 0x374   :  { %v792_v57 = vpop.xlane.xlu0 %791 }
 0x375   :  { %2659 = vpow2.f32 %v813_v56  ;;  %v808_v58 = vsub.f32 %v2890_v28, %v792_v57 }
 0x377   :  { %v819_v60 = vmul.f32 1.442695, %v808_v58 }
 0x378   :  { %v628_v61 = vpop.permute.xlu0 %627  ;;  %v837_v16 = vpop.xlane.xlu1 %836 }
 0x379   :  { %2661 = vpow2.f32 %v819_v60  ;;  %2517 = vmatpush3.xpose.msk.msra.mxu0 %vm159_vm2, %v628_v61 }
 0x37a   :  { %2526 = vmatprep.subr.mxu0 %v2740_v6 }
 0x37c   :  { %2519 = vmatmul.mubr.msk.f32.vlgmr.msra.gmra.mxu0 %vm159_vm2, %v626_v59  ;;  %v1318_v24 = vpop.permute.xlu1 %1317 }
 0x37d   :  { %2527 = vmatpush3.msra.mxu0 %v870_v62  ;;  %2528 = vmatprep.mubr.msk.f32.mxu0 %vm2741_vm1, %v2740_v6 }
 0x37e   :  { %2536 = vmatprep.subr.mxu0 %v2740_v6 }
 0x382   :  { %v2660_v63 = vpop.eup %2659 }
 0x383   :  { %v829_v0 = vsel %vm159_vm2, %v2660_v63, 0.0 }
 0x384   :  { %830 = vadd.xlane.f32.xlu0 %v829_v0 }
 0x386   :  { %v2662_v1 = vpop.eup %2661 }
 0x387   :  { %v838_v3 = vsel %vm159_vm2, %v2662_v1, 0.0 }
 0x388   :  { %839 = vadd.xlane.f32.xlu0 %v838_v3 }
 0x39e   :  { %1167 = vrot.lane.b32.xlu0 %v2849_v10, %s2752_s24 }
 0x3a3   :  { %v2949_v4 = vpop.f32.mrf.mxu0 }
 0x3a4   :  { %v793_v33 = vsel %vm159_vm2, %v2949_v4, -inf }
 0x3a5   :  { %v2510_v7 = vpop.f32.mrf.mxu0 }
 0x3bd   :  { %797 = vmax.xlane.f32.xlu0 %v796_v8 }
 0x3d3   :  { %1543 = vrot.lane.b32.xlu0 %v2862_v12, %s2749_s19 }
 0x400   :  { %v2955_v9 = vpop.f32.mrf.mxu1 }
 0x401   :  { %v802_v36 = vsel %vm159_vm2, %v2955_v9, -inf }
 0x402   :  { %v2525_v11 = vpop.f32.mrf.mxu1 }
 0x40c   :  { %v1017_v13 = vpop.f32.mrf.mxu1 }
 0x40d   :  { %v831_v14 = vpop.xlane.xlu0 %830 }
 0x40e   :  { %2663 = vrcp.f32 %v831_v14  ;;  %v2535_v15 = vpop.f32.mrf.mxu1 }
 0x40f   :  { %2665 = vrcp.f32 %v837_v16 }
 0x411   :  { %v840_v10 = vpop.xlane.xlu0 %839 }
 0x412   :  { %2667 = vrcp.f32 %v840_v10 }
 0x415   :  { %v1168_v21 = vpop.permute.xlu0 %1167 }
 0x41b   :  { %v2664_v17 = vpop.eup %2663 }
 0x41c   :  { %v854_v18 = vmul.f32 %v2664_v17, %v2660_v63  ;;  %v2666_v20 = vpop.eup %2665 }
 0x41d   :  { %v858_v22 = vmul.f32 %v2666_v20, %v2920_v46 }
 0x41e   :  { %2529 = vmatmul.mubr.msk.f32.vlgmr.msra.gmra.mxu0 %vm159_vm2, %v854_v18  ;;  %v2396_v18 = vld [vmem:[%s3143_s4] ss:$0 sm:$0xff] }
 0x41f   :  { %2537 = vmatpush3.msra.mxu0 %v2960_v19  ;;  %2538 = vmatprep.mubr.msk.f32.mxu0 %vm2741_vm1, %v2740_v6  ;;  %v2668_v23 = vpop.eup %2667 }
 0x420   :  { %2546 = vmatprep.subr.mxu0 %v2740_v6  ;;  %v860_v25 = vmul.f32 %v2668_v23, %v2662_v1 }
 0x422   :  { %2539 = vmatmul.mubr.msk.f32.vlgmr.msra.gmra.mxu0 %vm159_vm2, %v1017_v13 }
 0x423   :  { %2547 = vmatpush3.msra.mxu0 %v1168_v21  ;;  %2548 = vmatprep.mubr.msk.f32.mxu0 %vm2741_vm1, %v2740_v6 }
 0x424   :  { %2556 = vmatprep.subr.mxu0 %v2740_v6 }
 0x426   :  { %2549 = vmatmul.mubr.msk.f32.vlgmr.msra.gmra.mxu0 %vm159_vm2, %v858_v22 }
 0x427   :  { %2557 = vmatpush3.msra.mxu0 %v1318_v24  ;;  %2558 = vmatprep.mubr.msk.f32.mxu0 %vm2741_vm1, %v2740_v6 }
 0x428   :  { %2566 = vmatprep.subr.mxu0 %v2740_v6 }
 0x42a   :  { %2559 = vmatmul.mubr.msk.f32.vlgmr.msra.gmra.mxu0 %vm159_vm2, %v860_v25 }
 0x42b   :  { %2568 = vmatprep.mubr.msk.f32.mxu0 %vm2741_vm1, %v2740_v6 }
 0x43c   :  { %v699_v26 = vpop.f32.mrf.mxu0 }
 0x43d   :  { %v799_v35 = vsel %vm159_vm2, %v699_v26, -inf }
 0x43e   :  { %v2520_v27 = vpop.f32.mrf.mxu0 }
 0x446   :  { %v798_v28 = vpop.xlane.xlu0 %797 }
 0x447   :  { %v810_v29 = vsub.f32 %v2935_v52, %v798_v28 }
 0x449   :  { %v823_v30 = vmul.f32 1.442695, %v810_v29 }
 0x44a   :  { %v1544_v50 = vpop.permute.xlu0 %1543 }
 0x44b   :  { %2669 = vpow2.f32 %v823_v30 }
 0x458   :  { %v2670_v31 = vpop.eup %2669 }
 0x459   :  { %v844_v32 = vsel %vm159_vm2, %v2670_v31, 0.0 }
 0x45a   :  { %845 = vadd.xlane.f32.xlu1 %v844_v32 }
 0x45e   :  { %794 = vmax.xlane.f32.xlu1 %v793_v33 }
 0x462   :  { %800 = vmax.xlane.f32.xlu1 %v799_v35 }
 0x466   :  { %803 = vmax.xlane.f32.xlu1 %v802_v36 }
 0x4de   :  { %v941_v38 = vpop.f32.mrf.mxu0 }
 0x4df   :  { %2544 = vmatmul.mubr.msk.f32.vlgmr.msra.gmra.mxu1 %vm159_vm2, %v941_v38 }
 0x4e0   :  { %v2530_v39 = vpop.f32.mrf.mxu0  ;;  %2552 = vmatpush3.msra.mxu1 %v2993_v37  ;;  %2553 = vmatprep.mubr.msk.f32.mxu1 %vm2741_vm1, %v2740_v6 }
 0x4e1   :  { %2561 = vmatprep.subr.mxu1 %v2740_v6 }
 0x4e2   :  { %v3000_v40 = vpop.f32.mrf.mxu0 }
 0x4e3   :  { %v846_v41 = vpop.xlane.xlu1 %845 }
 0x4e4   :  { %2671 = vrcp.f32 %v846_v41  ;;  %v2540_v42 = vpop.f32.mrf.mxu0 }
 0x4e6   :  { %v1239_v44 = vpop.f32.mrf.mxu0 }
 0x4e7   :  { %v795_v45 = vpop.xlane.xlu1 %794  ;;  %2554 = vmatmul.mubr.msk.f32.vlgmr.msra.gmra.mxu1 %vm159_vm2, %v1239_v44 }
 0x4e8   :  { %v809_v46 = vsub.f32 %v2949_v4, %v795_v45  ;;  %v2550_v47 = vpop.f32.mrf.mxu0  ;;  %2562 = vmatpush3.msra.mxu1 %v3005_v43  ;;  %2563 = vmatprep.mubr.msk.f32.mxu1 %vm2741_vm1, %v2740_v6 }
 0x4e9   :  { %2571 = vmatprep.subr.mxu1 %v2740_v6 }
 0x4ea   :  { %v821_v48 = vmul.f32 1.442695, %v809_v46  ;;  %v1389_v49 = vpop.f32.mrf.mxu0 }
 0x4eb   :  { %v801_v51 = vpop.xlane.xlu1 %800  ;;  %2564 = vmatmul.mubr.msk.f32.vlgmr.msra.gmra.mxu1 %vm159_vm2, %v1389_v49 }
 0x4ec   :  { %2673 = vpow2.f32 %v821_v48  ;;  %v811_v52 = vsub.f32 %v699_v26, %v801_v51  ;;  %2572 = vmatpush3.msra.mxu1 %v1544_v50  ;;  %v2560_v53 = vpop.f32.mrf.mxu0  ;;  %2573 = vmatprep.mubr.msk.f32.mxu1 %vm2741_vm1, %v2740_v6 }
 0x4ed   :  { %2581 = vmatprep.subr.mxu1 %v2740_v6 }
 0x4ee   :  { %v825_v54 = vmul.f32 1.442695, %v811_v52 }
 0x4ef   :  { %v804_v55 = vpop.xlane.xlu1 %803 }
 0x4f0   :  { %2675 = vpow2.f32 %v825_v54  ;;  %v812_v56 = vsub.f32 %v2955_v9, %v804_v55 }
 0x4f1   :  { %v2672_v57 = vpop.eup %2671 }
 0x4f2   :  { %v827_v58 = vmul.f32 1.442695, %v812_v56  ;;  %v864_v59 = vmul.f32 %v2672_v57, %v2670_v31 }
 0x4f4   :  { %2677 = vpow2.f32 %v827_v58  ;;  %2574 = vmatmul.mubr.msk.f32.vlgmr.msra.gmra.mxu1 %vm159_vm2, %v864_v59 }
 0x4f5   :  { %2582 = vmatpush3.msra.mxu1 %v57_v34  ;;  %2583 = vmatprep.mubr.msk.f32.mxu1 %vm2741_vm1, %v2740_v6 }
 0x4f6   :  { %2591 = vmatprep.subr.mxu1 %v2740_v6 }
 0x4f9   :  { %v2674_v60 = vpop.eup %2673 }
 0x4fa   :  { %v841_v61 = vsel %vm159_vm2, %v2674_v60, 0.0 }
 0x4fb   :  { %842 = vadd.xlane.f32.xlu1 %v841_v61 }
 0x4fd   :  { %v2676_v62 = vpop.eup %2675 }
 0x4fe   :  { %v847_v63 = vsel %vm159_vm2, %v2676_v62, 0.0 }
 0x4ff   :  { %848 = vadd.xlane.f32.xlu1 %v847_v63 }
 0x501   :  { %v2678_v0 = vpop.eup %2677 }
 0x502   :  { %v850_v1 = vsel %vm159_vm2, %v2678_v0, 0.0 }
 0x503   :  { %851 = vadd.xlane.f32.xlu0 %v850_v1  ;;  %v3073_v1 = vld [vmem:[%s3149_s10] ss:$0 sm:$0xff] }
 0x510   :  { %1467 = vrot.lane.b32.xlu1 %v2862_v12, %s2750_s22 }
 0x514   :  { %1765 = vrot.lane.b32.xlu1 %v2862_v12, %s2752_s24 }
 0x518   :  { %1915 = vrot.lane.b32.xlu1 %v2862_v12, %s2751_s23 }
 0x584   :  { %v843_v3 = vpop.xlane.xlu1 %842 }
 0x585   :  { %2679 = vrcp.f32 %v843_v3 }
 0x588   :  { %v849_v4 = vpop.xlane.xlu1 %848 }
 0x589   :  { %2681 = vrcp.f32 %v849_v4 }
 0x58c   :  { %v1468_v7 = vpop.permute.xlu1 %1467  ;;  %v852_v14 = vpop.xlane.xlu0 %851 }
 0x58d   :  { %2567 = vmatpush3.msra.mxu0 %v1468_v7  ;;  %2683 = vrcp.f32 %v852_v14  ;;  %v2122_v7 = vld [vmem:[%s3144_s5 + $0x18] sm:$0xff]  ;;  %v2218_v14 = vld [vmem:[%s3146_s7 + $0x28] sm:$0xff] }
 0x58e   :  { %2576 = vmatprep.subr.mxu0 %v2740_v6 }
 0x590   :  { %v1766_v24 = vpop.permute.xlu1 %1765 }
 0x592   :  { %v2680_v8 = vpop.eup %2679 }
 0x593   :  { %v862_v9 = vmul.f32 %v2680_v8, %v2674_v60  ;;  %v2121_v8 = vld [vmem:[%s3144_s5 + $0x10] sm:$0xff] }
 0x594   :  { %v1916_v30 = vpop.permute.xlu1 %1915 }
 0x595   :  { %2569 = vmatmul.mubr.msk.f32.vlgmr.msra.gmra.mxu0 %vm159_vm2, %v862_v9  ;;  %v2120_v9 = vld [vmem:[%s3144_s5 + $0x8] sm:$0xff] }
 0x596   :  { %2577 = vmatpush3.msra.mxu0 %v2960_v19  ;;  %2578 = vmatprep.mubr.msk.f32.mxu0 %vm2741_vm1, %v2740_v6  ;;  %v2682_v25 = vpop.eup %2681 }
 0x597   :  { %2586 = vmatprep.subr.mxu0 %v2740_v6  ;;  %v866_v28 = vmul.f32 %v2682_v25, %v2676_v62  ;;  %v2213_v25 = vld [vmem:[%s3146_s7] sm:$0xff] }
 0x59a   :  { %v2684_v29 = vpop.eup %2683 }
 0x59f   :  { %v1163_v11 = vpop.f32.mrf.mxu1 }
 0x5a0   :  { %v1164_v15 = vadd.f32 %v1163_v11, %v3000_v40  ;;  %v2119_v11 = vld [vmem:[%s3144_s5] sm:$0xff] }
 0x5a1   :  { %v2545_v12 = vpop.f32.mrf.mxu1 }
 0x5a2   :  { %v2220_v12 = vld [vmem:[%s3146_s7 + $0x38] sm:$0xff] }
 0x5a7   :  { %v1312_v13 = vpop.f32.mrf.mxu1 }
 0x5a8   :  { %v1316_v10 = vadd.f32 %v1312_v13, %v1164_v15  ;;  %v2219_v13 = vld [vmem:[%s3146_s7 + $0x30] sm:$0xff]  ;;  %v2217_v15 = vld [vmem:[%s3146_s7 + $0x20] sm:$0xff] }
 0x5a9   :  { %v2555_v16 = vpop.f32.mrf.mxu1 }
 0x5ab   :  { %v1462_v17 = vpop.f32.mrf.mxu1 }
 0x5ac   :  { %v1466_v19 = vadd.f32 %v1462_v17, %v1316_v10 }
 0x5ad   :  { %v2565_v20 = vpop.f32.mrf.mxu1 }
 0x5ae   :  { %v2072_v21 = vadd.f32 %v2396_v18, %v1466_v19 }
 0x5b0   :  { %v2074_v22 = vadd.f32 %v2072_v21, %v2826_v2  ;;  %v868_v2 = vmul.f32 %v2684_v29, %v2678_v0 }
 0x5b2   :  { %v2076_v23 = vsel %vm72_vm0, %v2074_v22, 0.0 }
 0x5b3   :  { %2077 = vadd.xlane.f32.xlu1 %v2076_v23  ;;  %v2215_v23 = vld [vmem:[%s3146_s7 + $0x10] sm:$0xff] }
 0x5b4   :  { %v1615_v26 = vpop.f32.mrf.mxu1 }
 0x5b5   :  { %2579 = vmatmul.mubr.msk.f32.vlgmr.msra.gmra.mxu0 %vm159_vm2, %v1615_v26  ;;  %v2399_v26 = vld [vmem:[%s3145_s6] ss:$0 sm:$0xff]  ;;  %s2753_s6 = smov [#allocation5]  }
 0x5b6   :  { %2587 = vmatpush3.msra.mxu0 %v1766_v24  ;;  %v2575_v27 = vpop.f32.mrf.mxu1  ;;  %2588 = vmatprep.mubr.msk.f32.mxu0 %vm2741_vm1, %v2740_v6  ;;  %v2214_v24 = vld [vmem:[%s3146_s7 + $0x8] sm:$0xff] }
 0x5b7   :  { %2596 = vmatprep.subr.mxu0 %v2740_v6 }
 0x5b9   :  { %2589 = vmatmul.mubr.msk.f32.vlgmr.msra.gmra.mxu0 %vm159_vm2, %v866_v28 }
 0x5ba   :  { %2597 = vmatpush3.msra.mxu0 %v1916_v30  ;;  %2598 = vmatprep.mubr.msk.f32.mxu0 %vm2741_vm1, %v2740_v6 }
 0x5bb   :  { %2606 = vmatprep.subr.mxu0 %v2122_v7 }
 0x5bd   :  { %2599 = vmatmul.mubr.msk.f32.vlgmr.msra.gmra.mxu0 %vm159_vm2, %v868_v2 }
 0x5be   :  { %2607 = vmatpush3.msra.mxu0 %v2122_v7 }
 0x5bf   :  { %2608 = vmatprep.subr.mxu0 %v2121_v8 }
 0x5c0   :  { %2609 = vmatpush3.msra.mxu0 %v2121_v8 }
 0x5c1   :  { %2610 = vmatprep.subr.mxu0 %v2120_v9 }
 0x5c2   :  { %2611 = vmatpush3.msra.mxu0 %v2120_v9 }
 0x5c3   :  { %2612 = vmatprep.subr.mxu0 %v2119_v11 }
 0x5c4   :  { %2613 = vmatpush3.msra.mxu0 %v2119_v11 }
 0x63c   :  { %v2078_v41 = vpop.xlane.xlu1 %2077 }
 0x63d   :  { %v2083_v46 = vmul.f32 0.03125, %v2078_v41 }
 0x655   :  { %v1539_v31 = vpop.f32.mrf.mxu0 }
 0x656   :  { %2584 = vmatmul.mubr.msk.f32.vlgmr.msra.gmra.mxu1 %vm159_vm2, %v1539_v31 }
 0x657   :  { %v2570_v32 = vpop.f32.mrf.mxu0  ;;  %2592 = vmatpush3.msra.mxu1 %v2993_v37  ;;  %2593 = vmatprep.mubr.msk.f32.mxu1 %vm2741_vm1, %v2740_v6 }
 0x658   :  { %2601 = vmatprep.subr.mxu1 %v2740_v6 }
 0x675   :  { %v1688_v33 = vpop.f32.mrf.mxu0 }
 0x677   :  { %v2580_v34 = vpop.f32.mrf.mxu0 }
 0x679   :  { %v1837_v35 = vpop.f32.mrf.mxu0 }
 0x67a   :  { %2594 = vmatmul.mubr.msk.f32.vlgmr.msra.gmra.mxu1 %vm159_vm2, %v1837_v35 }
 0x67b   :  { %2602 = vmatpush3.msra.mxu1 %v3005_v43  ;;  %v2590_v36 = vpop.f32.mrf.mxu0  ;;  %2603 = vmatprep.mubr.msk.f32.mxu1 %vm2741_vm1, %v2740_v6  ;;  %v2085_v43 = vsub.f32 %v2074_v22, %v2083_v46  ;;  %v2216_v22 = vld [vmem:[%s3146_s7 + $0x18] sm:$0xff]  ;;  %s2349_s7 = sshll.u32 %s2753_s6, 4  ;;  %s2350_s7 = int_to_ptr.vmem [resolvable:$true] %s2349_s7 }
 0x67c   :  { %2617 = vmatprep.subr.mxu1 %v2220_v12  ;;  %p2718_p6 = scmp.lt.s32.totalorder %s2350_s7, %s2350_s7 }
 0x67d   :  { %v1987_v38 = vpop.f32.mrf.mxu0  ;;  %v2087_v53 = vmul.f32 %v2085_v43, %v2085_v43 }
 0x67e   :  { %2604 = vmatmul.mubr.msk.f32.vlgmr.msra.gmra.mxu1 %vm159_vm2, %v1987_v38 }
 0x67f   :  { %v2600_v37 = vpop.f32.mrf.mxu0  ;;  %v2089_v54 = vsel %vm72_vm0, %v2087_v53, 0.0  ;;  %2618 = vmatpush3.msra.mxu1 %v2220_v12 }
 0x680   :  { %2619 = vmatprep.subr.mxu1 %v2219_v13 }
 0x681   :  { %2620 = vmatpush3.msra.mxu1 %v2219_v13 }
 0x682   :  { %2621 = vmatprep.subr.mxu1 %v2218_v14 }
 0x683   :  { %2622 = vmatpush3.msra.mxu1 %v2218_v14 }
 0x684   :  { %2623 = vmatprep.subr.mxu1 %v2217_v15 }
 0x685   :  { %2624 = vmatpush3.msra.mxu1 %v2217_v15 }
 0x686   :  { %2625 = vmatprep.subr.mxu1 %v2216_v22 }
 0x687   :  { %2626 = vmatpush3.msra.mxu1 %v2216_v22 }
 0x688   :  { %2627 = vmatprep.subr.mxu1 %v2215_v23 }
 0x689   :  { %2628 = vmatpush3.msra.mxu1 %v2215_v23 }
 0x68a   :  { %2629 = vmatprep.subr.mxu1 %v2214_v24 }
 0x68b   :  { %2630 = vmatpush3.msra.mxu1 %v2214_v24 }
 0x68c   :  { %2631 = vmatprep.subr.mxu1 %v2213_v25 }
 0x68d   :  { %2632 = vmatpush3.msra.mxu1 %v2213_v25 }
 0x716   :  { %v1761_v39 = vpop.f32.mrf.mxu1 }
 0x717   :  { %v1762_v44 = vadd.f32 %v1761_v39, %v1688_v33  ;;  %v2402_v33 = vld [vmem:[%s3147_s8] ss:$0 sm:$0xff]  ;;  %s2713_s8 = scalar_lea.vmem %s2350_s7, 256 }
 0x718   :  { %v2585_v40 = vpop.f32.mrf.mxu1  ;;  %p2714_p5 = scmp.ne.s32.totalorder %s2350_s7, %s2713_s8  ;;  %p2719_p7 = scmp.lt.s32.totalorder %s2713_s8, %s2713_s8 }
 0x71a   :  { %p2720_p8 = por %p2719_p7, %p2718_p6 }
 0x71c   :  { %p2721_p9 = pnand %p2720_p8, %p2714_p5 }
 0x73a   :  { %v1910_v42 = vpop.f32.mrf.mxu1 }
 0x73b   :  { %v1914_v47 = vadd.f32 %v1910_v42, %v1762_v44 }
 0x73c   :  { %v2595_v45 = vpop.f32.mrf.mxu1 }
 0x73e   :  { %v2060_v48 = vpop.f32.mrf.mxu1 }
 0x73f   :  { %v2064_v49 = vadd.f32 %v2060_v48, %v1914_v47 }
 0x740   :  { %v2605_v50 = vpop.f32.mrf.mxu1 }
 0x741   :  { %v2073_v51 = vadd.f32 %v2396_v18, %v2064_v49 }
 0x743   :  { %v2075_v52 = vadd.f32 %v2073_v51, %v2836_v5  ;;  %v3068_v5 = vld [vmem:[%s3148_s9] ss:$0 sm:$0xff] }
 0x745   :  { %v2079_v6 = vsel %vm72_vm0, %v2075_v52, 0.0 }
 0x746   :  { %2080 = vadd.xlane.f32.xlu0 %v2079_v6 }
 0x74a   :  { %2090 = vadd.xlane.f32.xlu0 %v2089_v54 }
 0x7cf   :  { %v2081_v55 = vpop.xlane.xlu0 %2080 }
 0x7d0   :  { %v2084_v56 = vmul.f32 0.03125, %v2081_v55 }
 0x7d2   :  { %v2086_v57 = vsub.f32 %v2075_v52, %v2084_v56 }
 0x7d3   :  { %v2091_v58 = vpop.xlane.xlu0 %2090 }
 0x7d4   :  { %v2095_v59 = vmul.f32 0.03125, %v2091_v58  ;;  %v2088_v60 = vmul.f32 %v2086_v57, %v2086_v57 }
 0x7d6   :  { %v2097_v61 = vadd.f32 1e-05, %v2095_v59  ;;  %v2092_v62 = vsel %vm72_vm0, %v2088_v60, 0.0 }
 0x7d7   :  { %2093 = vadd.xlane.f32.xlu0 %v2092_v62 }
 0x7d8   :  { %2685 = vrsqrt.f32 %v2097_v61 }
 0x7e5   :  { %v2686_v63 = vpop.eup %2685 }
 0x7e6   :  { %v2101_v0 = vmul.f32 %v2686_v63, %v2085_v43 }
 0x7e8   :  { %v2109_v3 = vmul.f32 %v3068_v5, %v2101_v0 }
 0x7ea   :  { %v2117_v4 = vadd.f32 %v3073_v1, %v2109_v3 }
 0x7ec   :  { %2614 = vmatprep.mubr.msk.f32.mxu0 %vm72_vm0, %v2117_v4 }
 0x860   :  { %v2094_v16 = vpop.xlane.xlu0 %2093 }
 0x861   :  { %v2096_v10 = vmul.f32 0.03125, %v2094_v16 }
 0x863   :  { %v2098_v17 = vadd.f32 1e-05, %v2096_v10 }
 0x865   :  { %2687 = vrsqrt.f32 %v2098_v17 }
 0x872   :  { %v2688_v18 = vpop.eup %2687 }
 0x873   :  { %v2102_v19 = vmul.f32 %v2688_v18, %v2086_v57 }
 0x875   :  { %v2110_v20 = vmul.f32 %v3068_v5, %v2102_v19 }
 0x877   :  { %v2118_v21 = vadd.f32 %v3073_v1, %v2110_v20 }
 0x879   :  { %2615 = vmatmul.mubr.msk.f32.vlgmr.msra.gmra.mxu0 %vm72_vm0, %v2118_v21 }
 0x939   :  { %v2616_v27 = vpop.f32.mrf.mxu0 }
 0x93a   :  { %v2208_v28 = vadd.f32 %v2616_v27, %v2399_v26 }
 0x93b   :  { %v2202_v29 = vpop.f32.mrf.mxu0 }
 0x93c   :  { %v2203_v30 = vadd.f32 %v2399_v26, %v2202_v29  ;;  %v2212_v31 = vmax.f32 %v2208_v28, 0.0 }
 0x93e   :  { %v2211_v2 = vmax.f32 %v2203_v30, 0.0 }
 0x940   :  { %2633 = vmatprep.mubr.msk.f32.mxu1 %vm2228_vm3, %v2211_v2 }
 0x941   :  { %2634 = vmatmul.mubr.msk.f32.vlgmr.msra.gmra.mxu1 %vm2228_vm3, %v2212_v31 }
 0xa01   :  { %v2635_v32 = vpop.f32.mrf.mxu1 }
 0xa02   :  { %v2307_v35 = vadd.f32 %v2635_v32, %v2402_v33 }
 0xa03   :  { %v2301_v34 = vpop.f32.mrf.mxu1 }
 0xa04   :  { %v2302_v36 = vadd.f32 %v2402_v33, %v2301_v34  ;;  %v2311_v39 = vadd.f32 %v2307_v35, %v2118_v21 }
 0xa06   :  { %v2310_v38 = vadd.f32 %v2302_v36, %v2117_v4  ;;  %v2315_v40 = vsel %vm72_vm0, %v2311_v39, 0.0 }
 0xa08   :  { %v2312_v37 = vsel %vm72_vm0, %v2310_v38, 0.0 }
 0xa09   :  { %2313 = vadd.xlane.f32.xlu0 %v2312_v37 }
 0xa0d   :  { %2316 = vadd.xlane.f32.xlu0 %v2315_v40 }
 0xa92   :  { %v2314_v41 = vpop.xlane.xlu0 %2313 }
 0xa93   :  { %v2318_v42 = vmul.f32 0.03125, %v2314_v41 }
 0xa95   :  { %v2320_v44 = vsub.f32 %v2310_v38, %v2318_v42 }
 0xa96   :  { %v2317_v45 = vpop.xlane.xlu0 %2316 }
 0xa97   :  { %v2319_v46 = vmul.f32 0.03125, %v2317_v45  ;;  %v2322_v47 = vmul.f32 %v2320_v44, %v2320_v44 }
 0xa99   :  { %v2321_v48 = vsub.f32 %v2311_v39, %v2319_v46  ;;  %v2324_v49 = vsel %vm72_vm0, %v2322_v47, 0.0 }
 0xa9a   :  { %2325 = vadd.xlane.f32.xlu0 %v2324_v49 }
 0xa9b   :  { %v2323_v50 = vmul.f32 %v2321_v48, %v2321_v48 }
 0xa9d   :  { %v2327_v43 = vsel %vm72_vm0, %v2323_v50, 0.0 }
 0xa9e   :  { %2328 = vadd.xlane.f32.xlu0 %v2327_v43 }
 0xb23   :  { %v2326_v51 = vpop.xlane.xlu0 %2325 }
 0xb24   :  { %v2330_v52 = vmul.f32 0.03125, %v2326_v51 }
 0xb26   :  { %v2332_v6 = vadd.f32 1e-05, %v2330_v52 }
 0xb27   :  { %v2329_v53 = vpop.xlane.xlu0 %2328 }
 0xb28   :  { %2689 = vrsqrt.f32 %v2332_v6  ;;  %v2331_v54 = vmul.f32 0.03125, %v2329_v53 }
 0xb2a   :  { %v2333_v55 = vadd.f32 1e-05, %v2331_v54 }
 0xb2c   :  { %2691 = vrsqrt.f32 %v2333_v55 }
 0xb35   :  { %v2690_v56 = vpop.eup %2689 }
 0xb36   :  { %v2336_v57 = vmul.f32 %v2690_v56, %v2320_v44 }
 0xb38   :  { %v2338_v58 = vmul.f32 %v3068_v5, %v2336_v57 }
 0xb39   :  { %v2692_v59 = vpop.eup %2691 }
 0xb3a   :  { %v2337_v60 = vmul.f32 %v2692_v59, %v2321_v48  ;;  %v2340_v61 = vadd.f32 %v3073_v1, %v2338_v58 }
 0xb3c   :  { %v2339_v62 = vmul.f32 %v3068_v5, %v2337_v60  ;;  %2342 = vst.msk [vmem:[#allocation5] sm:$0xff] %vm72_vm0, %v2340_v61 }
 0xb3e   :  { %v2341_v63 = vadd.f32 %v3073_v1, %v2339_v62 }
 0xb40   :  { %2343 = vst.msk [vmem:[#allocation5 + $0x8] sm:$0xff] %vm72_vm0, %v2341_v63 }
 0xb41   :  { %2724 = shalt.err (!%p2721_p9)
}
 0xb42   :  { %2355 = dma.vmem_to_hbm [thread:$0]  %s2350_s7, 256, %s3150_s11, [#allocation4], %s2738_s20, %s2738_s20, %s2739_s21  }
 0xb43   :  { %2735 = dma.done.wait [#allocation4], 256  }
 0xb44   :  { %2736 = vsyncadd [#allocation4], 4294967040 }
 0xb45   :  { %2359 = vsyncpa [#allocation3], 1 }
 0xb46   :  { %2360 = vsyncpa [#allocation4], 1 }

</bundles_post_ra>
